<compile_context>
chip_gen: v5e
topology: v5e:2x2
jax: 0.10.0
libtpu: 0.0.40
codegen_flags: <defaults>
</compile_context>

<pallas_src>
import jax
import jax.numpy as jnp
from jax import lax
from jax.experimental import pallas as pl
from jax.experimental.pallas import tpu as pltpu


def _rnn_fused_kernel(x_ref, w_ih_t_ref, w_hh_t_ref, out_ref, h_ref):
    """Fused input projection + serial tanh recurrence over one time chunk.

    x_ref:      (b_blk, t_chunk, I)   raw input chunk, batch-first
    w_ih_t_ref: (I, H)                input->hidden weight (transposed), resident
    w_hh_t_ref: (H, H)                hidden->hidden weight (transposed), resident
    out_ref:    (b_blk, t_chunk, H)   per-step hidden states, batch-first
    h_ref:      (b_blk, H) f32        hidden state carried across time chunks
    """
    t_idx = pl.program_id(1)

    @pl.when(t_idx == 0)
    def _init():                      # h_0 = 0 at the start of each batch block
        h_ref[...] = jnp.zeros_like(h_ref)

    w_ih_t = w_ih_t_ref[...]          # (I, H)  compute dtype (bf16 by default)
    w_hh_t = w_hh_t_ref[...]          # (H, H)  compute dtype
    cdt = w_hh_t.dtype
    t_chunk = x_ref.shape[1]

    # h lives in vregs across the bounded static unroll; the VMEM scratch is
    # touched once per chunk.  All slice offsets are static.
    h = h_ref[...]                    # (b_blk, H) f32
    for s in range(t_chunk):
        x_t = x_ref[:, s, :].astype(cdt)                       # (b_blk, I)
        # Input projection: independent of h -> off the serial critical path.
        xp = jnp.dot(x_t, w_ih_t, preferred_element_type=jnp.float32)
        # Serial part: bf16 operands, f32 MXU accumulation.
        hp = jnp.dot(h.astype(cdt), w_hh_t,
                     preferred_element_type=jnp.float32)
        h = jnp.tanh(xp + hp)                                  # f32, EUP
        out_ref[:, s, :] = h.astype(out_ref.dtype)             # lane-dense in H
    h_ref[...] = h


def _vmem_capacity_bytes():
    """Generation-aware VMEM capacity; conservative fallback (v7x per-TC)."""
    try:
        return int(pltpu.get_tpu_info().vmem_capacity_bytes)
    except Exception:
        return 64 * 1024 * 1024


def _pick_time_chunk(T, b_blk, I, H, x_isz, out_isz, cd_isz,
                     budget_bytes, max_unroll):
    """Largest time chunk that divides T, obeys the (8,128) sublane rule for
    the (b, t, h)/(b, t, i) blocks (t is the second-minor dim), keeps the
    static unroll bounded, and fits an HONEST VMEM estimate that includes the
    double-buffered resident weights and the h scratch."""
    fixed = 2 * (I * H + H * H) * cd_isz + b_blk * H * 4        # weights + h
    def chunk_bytes(tc):                                        # 2x = dbl buf
        return fixed + 2 * b_blk * tc * (I * x_isz + H * out_isz)

    cands = [tc for tc in range(1, T + 1)
             if T % tc == 0 and (tc % 8 == 0 or tc == T)]
    fitting = [tc for tc in cands
               if tc <= max_unroll and chunk_bytes(tc) <= budget_bytes]
    if fitting:
        tc = max(fitting)
    else:
        # Smallest legal chunk minimizes VMEM pressure (no full-T blowup).
        tc = min(cands)
    return tc, chunk_bytes(tc)


def rnn_forward(x, w_ih, w_hh, *, compute_dtype=jnp.bfloat16,
                vmem_budget_bytes=None, max_unroll=32):
    """x: (B, T, I) batch_first, w_ih: (H, I), w_hh: (H, H) -> (output, h_n)."""
    B, T, I = x.shape
    H = w_hh.shape[0]
    out_dtype = x.dtype
    cdt = jnp.dtype(compute_dtype)

    # Weights pre-transposed once (tiny), stored in the MXU compute dtype.
    w_ih_t = jnp.transpose(w_ih).astype(cdt)                    # (I, H)
    w_hh_t = jnp.transpose(w_hh).astype(cdt)                    # (H, H)

    # Full batch per serial step on a single TensorCore (splitting is pure
    # loss on v5e/v6e).  TODO(synk): CORE_PARALLEL batch split for v7x.
    b_blk = B

    cap = _vmem_capacity_bytes()
    budget = (vmem_budget_bytes if vmem_budget_bytes is not None
              else int(0.45 * cap))
    t_chunk, est_bytes = _pick_time_chunk(
        T, b_blk, I, H,
        jnp.dtype(x.dtype).itemsize, jnp.dtype(out_dtype).itemsize,
        cdt.itemsize, budget, max_unroll)
    grid = (B // b_blk, T // t_chunk)

    vmem_limit = int(min(cap, max(32 * 1024 * 1024, 2 * est_bytes)))

    out = pl.pallas_call(
        _rnn_fused_kernel,
        out_shape=jax.ShapeDtypeStruct((B, T, H), out_dtype),   # batch-first
        grid_spec=pltpu.PrefetchScalarGridSpec(
            num_scalar_prefetch=0,
            grid=grid,
            in_specs=[
                pl.BlockSpec((b_blk, t_chunk, I), lambda b, t: (b, t, 0)),
                pl.BlockSpec((I, H), lambda b, t: (0, 0)),      # resident W_ih^T
                pl.BlockSpec((H, H), lambda b, t: (0, 0)),      # resident W_hh^T
            ],
            out_specs=pl.BlockSpec((b_blk, t_chunk, H), lambda b, t: (b, t, 0)),
            scratch_shapes=[pltpu.VMEM((b_blk, H), jnp.float32)],
        ),
        compiler_params=pltpu.CompilerParams(
            # NOTE: time axis must stay the inner, "arbitrary" axis — the h
            # scratch carries state across it.
            dimension_semantics=("parallel", "arbitrary"),
            vmem_limit_bytes=vmem_limit,
        ),
    )(x, w_ih_t, w_hh_t)

    # h_n is just the last timestep of the main output (no second pallas
    # output / extra writeback bookkeeping needed).
    h_n = out[:, -1, :][None]                                   # (1, B, H)
    return out, h_n


def rnn_reference(x, w_ih, w_hh):
    """Pure-JAX reference matching torch.nn.RNN(bias=False, batch_first=True)."""
    B = x.shape[0]
    H = w_hh.shape[0]

    def step(h, x_t):
        h_new = jnp.tanh(x_t @ w_ih.T + h @ w_hh.T)
        return h_new, h_new

    h0 = jnp.zeros((B, H), x.dtype)
    h_last, outs = lax.scan(step, h0, jnp.transpose(x, (1, 0, 2)))
    return jnp.transpose(outs, (1, 0, 2)), h_last[None]


if __name__ == "__main__":
    key = jax.random.PRNGKey(0)

    # ---- Case 1: shapes implied by the original module (f32 compute path) --
    input_size, hidden_size, batch, seq_len = 3, 4, 2, 3
    k1, k2, k3, key = jax.random.split(key, 4)
    x = jax.random.normal(k1, (batch, seq_len, input_size), dtype=jnp.float32)
    bound = 1.0 / float(hidden_size) ** 0.5
    w_ih = jax.random.uniform(k2, (hidden_size, input_size),
                              minval=-bound, maxval=bound, dtype=jnp.float32)
    w_hh = jax.random.uniform(k3, (hidden_size, hidden_size),
                              minval=-bound, maxval=bound, dtype=jnp.float32)

    out, h_n = rnn_forward(x, w_ih, w_hh, compute_dtype=jnp.float32)
    out = jax.block_until_ready(out)
    h_n = jax.block_until_ready(h_n)

    ref_out, ref_hn = rnn_reference(x, w_ih, w_hh)
    assert out.shape == (batch, seq_len, hidden_size)
    assert h_n.shape == (1, batch, hidden_size)
    assert jnp.allclose(out, ref_out, atol=1e-4, rtol=1e-4)
    assert jnp.allclose(h_n, ref_hn, atol=1e-4, rtol=1e-4)

    # ---- Case 2: chunked time grid + default bf16 recurrent matmul ---------
    B2, T2, I2, H2 = 16, 16, 8, 16
    k1, k2, k3, key = jax.random.split(key, 4)
    x2 = jax.random.normal(k1, (B2, T2, I2), dtype=jnp.float32)
    b2 = 1.0 / float(H2) ** 0.5
    w_ih2 = jax.random.uniform(k2, (H2, I2), minval=-b2, maxval=b2,
                               dtype=jnp.float32)
    w_hh2 = jax.random.uniform(k3, (H2, H2), minval=-b2, maxval=b2,
                               dtype=jnp.float32)

    out2, hn2 = rnn_forward(x2, w_ih2, w_hh2, max_unroll=8)   # grid = (1, 2)
    out2 = jax.block_until_ready(out2)
    hn2 = jax.block_until_ready(hn2)

    ref_out2, ref_hn2 = rnn_reference(x2, w_ih2, w_hh2)
    assert out2.shape == (B2, T2, H2)
    assert hn2.shape == (1, B2, H2)
    # bf16 MXU operands (f32 accumulate): bounded by tanh, tolerance is loose.
    assert jnp.allclose(out2, ref_out2, atol=3e-2, rtol=3e-2)
    assert jnp.allclose(hn2, ref_hn2, atol=3e-2, rtol=3e-2)

    print("KERNEL_OK")
</pallas_src>

<mosaic_0001>
module attributes {stable_mosaic.version = 11 : i64} {
  func.func @_rnn_fused_kernel(%arg0: i32, %arg1: i32, %arg2: memref<2x3x3xf32, #tpu.memory_space<vmem>>, %arg3: memref<3x4xf32, #tpu.memory_space<vmem>>, %arg4: memref<4x4xf32, #tpu.memory_space<vmem>>, %arg5: memref<2x3x4xf32, #tpu.memory_space<vmem>>, %arg6: memref<2x4xf32, #tpu.memory_space<vmem>>) attributes {dimension_semantics = [#tpu.dimension_semantics<parallel>, #tpu.dimension_semantics<arbitrary>], iteration_bounds = array<i64: 1, 1>, scalar_prefetch = 0 : i64, scratch_operands = 1 : i64, tpu.core_type = #tpu.core_type<tc>, window_params = [{transform_indices = @transform_0, window_bounds = array<i64: 2, 3, 3>}, {pipeline_mode = #tpu.pipeline_mode<synchronous>, transform_indices = @transform_1, window_bounds = array<i64: 3, 4>}, {pipeline_mode = #tpu.pipeline_mode<synchronous>, transform_indices = @transform_2, window_bounds = array<i64: 4, 4>}, {transform_indices = @transform_3, window_bounds = array<i64: 2, 3, 4>}]} {
    %c0_i32 = arith.constant 0 : i32
    %0 = arith.cmpi eq, %arg1, %c0_i32 : i32
    %1 = arith.extui %0 : i1 to i32
    %c0_i32_0 = arith.constant 0 : i32
    %2 = arith.cmpi ne, %1, %c0_i32_0 : i32
    scf.if %2 {
      %cst_29 = arith.constant 0.000000e+00 : f32
      %34 = vector.broadcast %cst_29 : f32 to vector<2x4xf32>
      %c0_30 = arith.constant 0 : index
      %c0_31 = arith.constant 0 : index
      %35 = vector.load %arg6[%c0_30, %c0_31] : memref<2x4xf32, #tpu.memory_space<vmem>>, vector<2x4xf32>
      tpu.vector_store %arg6[%c0_30, %c0_31], %34 {strides = array<i32>} : memref<2x4xf32, #tpu.memory_space<vmem>>, vector<2x4xf32>,
    } else {
    }
    %c0 = arith.constant 0 : index
    %c0_1 = arith.constant 0 : index
    %3 = vector.load %arg3[%c0, %c0_1] : memref<3x4xf32, #tpu.memory_space<vmem>>, vector<3x4xf32>
    %c0_2 = arith.constant 0 : index
    %c0_3 = arith.constant 0 : index
    %4 = vector.load %arg4[%c0_2, %c0_3] : memref<4x4xf32, #tpu.memory_space<vmem>>, vector<4x4xf32>
    %c0_4 = arith.constant 0 : index
    %c0_5 = arith.constant 0 : index
    %5 = vector.load %arg6[%c0_4, %c0_5] : memref<2x4xf32, #tpu.memory_space<vmem>>, vector<2x4xf32>
    %c0_6 = arith.constant 0 : index
    %c0_7 = arith.constant 0 : index
    %c0_8 = arith.constant 0 : index
    %6 = vector.load %arg2[%c0_6, %c0_7, %c0_8] : memref<2x3x3xf32, #tpu.memory_space<vmem>>, vector<2x1x3xf32>
    %7 = vector.shape_cast %6 : vector<2x1x3xf32> to vector<2x3xf32>
    %cst = arith.constant dense<0.000000e+00> : vector<2x4xf32>
    %8 = tpu.matmul %7, %3, %cst {dimension_numbers = #tpu.dot_dimension_numbers<[1], [0], [0], [1], [0, 0, 1, 1], [], []>} : vector<2x3xf32>, vector<3x4xf32>, vector<2x4xf32> -> vector<2x4xf32>
    %cst_9 = arith.constant dense<0.000000e+00> : vector<2x4xf32>
    %9 = tpu.matmul %5, %4, %cst_9 {dimension_numbers = #tpu.dot_dimension_numbers<[1], [0], [0], [1], [0, 0, 1, 1], [], []>} : vector<2x4xf32>, vector<4x4xf32>, vector<2x4xf32> -> vector<2x4xf32>
    %10 = arith.addf %8, %9 : vector<2x4xf32>
    %11 = math.tanh %10 : vector<2x4xf32>
    %c0_10 = arith.constant 0 : index
    %c0_11 = arith.constant 0 : index
    %c0_12 = arith.constant 0 : index
    %12 = vector.load %arg5[%c0_10, %c0_11, %c0_12] : memref<2x3x4xf32, #tpu.memory_space<vmem>>, vector<2x1x4xf32>
    %13 = vector.shape_cast %12 : vector<2x1x4xf32> to vector<2x4xf32>
    %14 = vector.shape_cast %11 : vector<2x4xf32> to vector<2x1x4xf32>
    tpu.vector_store %arg5[%c0_10, %c0_11, %c0_12], %14 {strides = array<i32>} : memref<2x3x4xf32, #tpu.memory_space<vmem>>, vector<2x1x4xf32>,
    %c0_13 = arith.constant 0 : index
    %c1 = arith.constant 1 : index
    %c0_14 = arith.constant 0 : index
    %15 = vector.load %arg2[%c0_13, %c1, %c0_14] : memref<2x3x3xf32, #tpu.memory_space<vmem>>, vector<2x1x3xf32>
    %16 = vector.shape_cast %15 : vector<2x1x3xf32> to vector<2x3xf32>
    %cst_15 = arith.constant dense<0.000000e+00> : vector<2x4xf32>
    %17 = tpu.matmul %16, %3, %cst_15 {dimension_numbers = #tpu.dot_dimension_numbers<[1], [0], [0], [1], [0, 0, 1, 1], [], []>} : vector<2x3xf32>, vector<3x4xf32>, vector<2x4xf32> -> vector<2x4xf32>
    %cst_16 = arith.constant dense<0.000000e+00> : vector<2x4xf32>
    %18 = tpu.matmul %11, %4, %cst_16 {dimension_numbers = #tpu.dot_dimension_numbers<[1], [0], [0], [1], [0, 0, 1, 1], [], []>} : vector<2x4xf32>, vector<4x4xf32>, vector<2x4xf32> -> vector<2x4xf32>
    %19 = arith.addf %17, %18 : vector<2x4xf32>
    %20 = math.tanh %19 : vector<2x4xf32>
    %c0_17 = arith.constant 0 : index
    %c1_18 = arith.constant 1 : index
    %c0_19 = arith.constant 0 : index
    %21 = vector.load %arg5[%c0_17, %c1_18, %c0_19] : memref<2x3x4xf32, #tpu.memory_space<vmem>>, vector<2x1x4xf32>
    %22 = vector.shape_cast %21 : vector<2x1x4xf32> to vector<2x4xf32>
    %23 = vector.shape_cast %20 : vector<2x4xf32> to vector<2x1x4xf32>
    tpu.vector_store %arg5[%c0_17, %c1_18, %c0_19], %23 {strides = array<i32>} : memref<2x3x4xf32, #tpu.memory_space<vmem>>, vector<2x1x4xf32>,
    %c0_20 = arith.constant 0 : index
    %c2 = arith.constant 2 : index
    %c0_21 = arith.constant 0 : index
    %24 = vector.load %arg2[%c0_20, %c2, %c0_21] : memref<2x3x3xf32, #tpu.memory_space<vmem>>, vector<2x1x3xf32>
    %25 = vector.shape_cast %24 : vector<2x1x3xf32> to vector<2x3xf32>
    %cst_22 = arith.constant dense<0.000000e+00> : vector<2x4xf32>
    %26 = tpu.matmul %25, %3, %cst_22 {dimension_numbers = #tpu.dot_dimension_numbers<[1], [0], [0], [1], [0, 0, 1, 1], [], []>} : vector<2x3xf32>, vector<3x4xf32>, vector<2x4xf32> -> vector<2x4xf32>
    %cst_23 = arith.constant dense<0.000000e+00> : vector<2x4xf32>
    %27 = tpu.matmul %20, %4, %cst_23 {dimension_numbers = #tpu.dot_dimension_numbers<[1], [0], [0], [1], [0, 0, 1, 1], [], []>} : vector<2x4xf32>, vector<4x4xf32>, vector<2x4xf32> -> vector<2x4xf32>
    %28 = arith.addf %26, %27 : vector<2x4xf32>
    %29 = math.tanh %28 : vector<2x4xf32>
    %c0_24 = arith.constant 0 : index
    %c2_25 = arith.constant 2 : index
    %c0_26 = arith.constant 0 : index
    %30 = vector.load %arg5[%c0_24, %c2_25, %c0_26] : memref<2x3x4xf32, #tpu.memory_space<vmem>>, vector<2x1x4xf32>
    %31 = vector.shape_cast %30 : vector<2x1x4xf32> to vector<2x4xf32>
    %32 = vector.shape_cast %29 : vector<2x4xf32> to vector<2x1x4xf32>
    tpu.vector_store %arg5[%c0_24, %c2_25, %c0_26], %32 {strides = array<i32>} : memref<2x3x4xf32, #tpu.memory_space<vmem>>, vector<2x1x4xf32>,
    %c0_27 = arith.constant 0 : index
    %c0_28 = arith.constant 0 : index
    %33 = vector.load %arg6[%c0_27, %c0_28] : memref<2x4xf32, #tpu.memory_space<vmem>>, vector<2x4xf32>
    tpu.vector_store %arg6[%c0_27, %c0_28], %29 {strides = array<i32>} : memref<2x4xf32, #tpu.memory_space<vmem>>, vector<2x4xf32>,
    return
  }
  func.func @transform_0(%arg0: i32, %arg1: i32) -> (i32, i32, i32) {
    %c0_i32 = arith.constant 0 : i32
    %c0_i32_0 = arith.constant 0 : i32
    return %arg0, %arg1, %c0_i32 : i32, i32, i32
  }
  func.func @transform_1(%arg0: i32, %arg1: i32) -> (i32, i32) {
    %c0_i32 = arith.constant 0 : i32
    %c0_i32_0 = arith.constant 0 : i32
    %c0_i32_1 = arith.constant 0 : i32
    return %c0_i32, %c0_i32_0 : i32, i32
  }
  func.func @transform_2(%arg0: i32, %arg1: i32) -> (i32, i32) {
    %c0_i32 = arith.constant 0 : i32
    %c0_i32_0 = arith.constant 0 : i32
    %c0_i32_1 = arith.constant 0 : i32
    return %c0_i32, %c0_i32_0 : i32, i32
  }
  func.func @transform_3(%arg0: i32, %arg1: i32) -> (i32, i32, i32) {
    %c0_i32 = arith.constant 0 : i32
    %c0_i32_0 = arith.constant 0 : i32
    return %arg0, %arg1, %c0_i32 : i32, i32, i32
  }
}

</mosaic_0001>

<bundles_post_ra>
// kernel: tpu_custom_call.1
= control target key start
LH: loop header
LB: loop body
LE: loop exit
PB: predicated region body
PF: predicated region fallthrough
CT: control target
= control target key end

     0   :  { %vm29_vm0 = vcmask 1043456   ;;  %vm61_vm1 = vcmask 1042432   ;;  %vm18_vm2 = vcmask 25600   ;;  %v229_v2 = vmov 0.0   ;;  %s315_s2 = inlined_call_operand.vmem [shape: f32[4,4], index: 2, kind: input, shape index: {}]   ;;  %s316_s1 = inlined_call_operand.vmem [shape: f32[3,4], index: 1, kind: input, shape index: {}]   ;;  %s317_s0 = inlined_call_operand.vmem [shape: f32[2,3,3], index: 0, kind: input, shape index: {}]   ;;  %s318_s3 = inlined_call_operand.vmem [shape: f32[2,3,4], index: 3, kind: output, shape index: {}]  }
   0x1   :  { %v21_v0 = vld [vmem:[%s315_s2] sm:$0xf]  ;;  %19 = vst.msk [vmem:[#allocation2] sm:$0x3] %vm18_vm2, %v229_v2  ;;  %v24_v4 = vld [vmem:[%s317_s0 + $0x4] sm:$0x1] }
   0x2   :  { %v20_v1 = vld [vmem:[%s316_s1] sm:$0x7]  ;;  %210 = vmatpush.msk.msra.mxu0 %vm29_vm0, %v21_v0  ;;  %vm56_vm3 = vcmask 1041409   ;;  %v55_v5 = vrot.slane %v24_v4, 7  ;;  %vm58_vm4 = vcmask 23552   ;;  %214 = vmatpush.msk.msra.mxu2 %vm29_vm0, %v21_v0  ;;  %vm25_vm5 = vcmask 31744  }
   0x3   :  { %212 = vmatpush.msk.msra.mxu1 %vm61_vm1, %v20_v1  ;;  %v23_v3 = vld [vmem:[%s317_s0] sm:$0x1]  ;;  %216 = vmatpush.msk.msra.mxu3 %vm61_vm1, %v20_v1  ;;  %v93_v8 = vld [vmem:[%s317_s0 + $0x5] sm:$0x1]  ;;  %v92_v10 = vld [vmem:[%s317_s0 + $0x1] sm:$0x1] }
   0x4   :  { %218 = vmatpush.msk.msrb.mxu0 %vm29_vm0, %v21_v0  ;;  %v57_v6 = vsel %vm56_vm3, %v55_v5, %v23_v3  ;;  %v118_v9 = vrot.slane %v93_v8, 7  ;;  %vm89_vm6 = vcmask 24576   ;;  %v149_v17 = vld [vmem:[%s317_s0 + $0x6] sm:$0x1]  ;;  %v148_v19 = vld [vmem:[%s317_s0 + $0x2] sm:$0x1] }
   0x5   :  { %220 = vmatpush.msk.msrb.mxu1 %vm61_vm1, %v20_v1  ;;  %v174_v18 = vrot.slane %v149_v17, 7 }
   0x6   :  { %213 = vmatmul.msk.f32.vlgmr.msra.gmra.mxu1 %vm58_vm4, %v57_v6  ;;  %v119_v11 = vsel %vm56_vm3, %v118_v9, %v92_v10 }
   0x7   :  { %217 = vmatmul.msk.f32.vlgmr.msra.gmra.mxu3 %vm58_vm4, %v119_v11  ;;  %v175_v20 = vsel %vm56_vm3, %v174_v18, %v148_v19 }
   0x8   :  { %v22_v7 = vld [vmem:[#allocation2] sm:$0x3] }
   0x9   :  { %211 = vmatmul.msk.f32.vlgmr.msra.gmra.mxu0 %vm25_vm5, %v22_v7 }
   0xe   :  { %221 = vmatmul.msk.f32.vlgmr.msrb.gmra.mxu1 %vm58_vm4, %v175_v20 }
  0x83   :  { %v82_v12 = vpop.f32.mrf.mxu1 }
  0x86   :  { %v50_v13 = vpop.f32.mrf.mxu0 }
  0x87   :  { %v83_v14 = vadd.f32 %v82_v12, %v50_v13 }
  0x89   :  { %223 = vtanh.f32 %v83_v14 }
  0x8a   :  { %v139_v21 = vpop.f32.mrf.mxu3 }
  0x8b   :  { %v195_v26 = vpop.f32.mrf.mxu1 }
  0x8f   :  { %v224_v15 = vpop.eup %223 }
  0x90   :  { %v87_v16 = vrot.slane %v224_v15, 1  ;;  %90 = vst.msk [vmem:[%s318_s3] sm:$0x1] %vm89_vm6, %v224_v15  ;;  %215 = vmatmul.msk.f32.vlgmr.msra.gmra.mxu2 %vm25_vm5, %v224_v15 }
  0x92   :  { %91 = vst.msk [vmem:[%s318_s3 + $0x4] sm:$0x1] %vm89_vm6, %v87_v16 }
 0x113   :  { %v113_v22 = vpop.f32.mrf.mxu2 }
 0x114   :  { %v140_v23 = vadd.f32 %v139_v21, %v113_v22 }
 0x116   :  { %225 = vtanh.f32 %v140_v23 }
 0x11c   :  { %v226_v24 = vpop.eup %225 }
 0x11d   :  { %v144_v25 = vrot.slane %v226_v24, 1  ;;  %146 = vst.msk [vmem:[%s318_s3 + $0x1] sm:$0x1] %vm89_vm6, %v226_v24  ;;  %219 = vmatmul.msk.f32.vlgmr.msrb.gmra.mxu0 %vm25_vm5, %v226_v24 }
 0x11f   :  { %147 = vst.msk [vmem:[%s318_s3 + $0x5] sm:$0x1] %vm89_vm6, %v144_v25 }
 0x19a   :  { %v169_v27 = vpop.f32.mrf.mxu0 }
 0x19b   :  { %v196_v28 = vadd.f32 %v195_v26, %v169_v27 }
 0x19d   :  { %227 = vtanh.f32 %v196_v28 }
 0x1a3   :  { %v228_v29 = vpop.eup %227 }
 0x1a4   :  { %v200_v30 = vrot.slane %v228_v29, 1  ;;  %202 = vst.msk [vmem:[%s318_s3 + $0x2] sm:$0x1] %vm89_vm6, %v228_v29 }
 0x1a5   :  { %205 = vst.msk [vmem:[#allocation2] sm:$0x3] %vm18_vm2, %v228_v29 }
 0x1a6   :  { %203 = vst.msk [vmem:[%s318_s3 + $0x6] sm:$0x1] %vm89_vm6, %v200_v30 }

</bundles_post_ra>
